<compile_context>
chip_gen: v7x
topology: tpu7x:2x2x1
jax: 0.10.0
libtpu: 0.0.40
codegen_flags: <defaults>
</compile_context>

<pallas_src>
import functools
import inspect

import jax
import jax.numpy as jnp
from jax.experimental import pallas as pl
from jax.experimental.pallas import tpu as pltpu


def _round_up(n: int, m: int) -> int:
    return (n + m - 1) // m * m


def _conv_down_ln_kernel(xr_ref, xh_ref, w12_ref, w0_ref, g_ref, b_ref, o_ref,
                         *, c_in, eps, mxu_dtype):
    """One (batch, L-tile) step of Conv1d(k=3, s=2, p=1, no bias) + LayerNorm.

    xr_ref : (1, tL, 2C)    pair-rows; row t holds [x[2t], x[2t+1]]
    xh_ref : (1, hR, 2C)    the hR pair-rows just before this tile; the odd
                            half of its last row is x[2*t0 - 1] (real block-0
                            data when this is the first tile -- masked below)
    w12_ref: (2C, C_out)    [W_tap1 ; W_tap2] stacked along K
    w0_ref : (C,  C_out)    W_tap0 (the tap reading x[2t - 1])
    g_ref  : (1, C_out)     LayerNorm gamma (f32)
    b_ref  : (1, C_out)     LayerNorm beta  (f32)
    o_ref  : (1, tL, C_out) output tile, already in (B, L_out, 2*dim) layout
    """
    l = pl.program_id(1)
    xr = xr_ref[0]                                    # (tL, 2C)
    tl = xr.shape[0]
    h_last = xh_ref.shape[1] - 1

    # Build the x[2t-1] stream: rotate the odd half down one pair-row on the
    # XLU (no scratch round trip) and patch row 0 from the halo block.  The
    # conv's left zero padding is realised by masking the halo row at l == 0.
    xr_odd = xr[:, c_in:]                             # (tL, C): x[2t+1]
    halo_odd = xh_ref[0, h_last:h_last + 1, c_in:]    # (1, C):  x[2*t0 - 1]
    halo_odd = jnp.where(l > 0, halo_odd, jnp.zeros_like(halo_odd))
    rolled = pltpu.roll(xr_odd, shift=1, axis=0)      # row t <- x[2(t-1)+1]
    row0 = jax.lax.broadcasted_iota(jnp.int32, (tl, c_in), 0) == 0
    prev_odd = jnp.where(row0, halo_odd, rolled)      # (tL, C): x[2t - 1]

    lhs12, lhs0 = xr, prev_odd
    if mxu_dtype is not None:
        lhs12 = lhs12.astype(mxu_dtype)
        lhs0 = lhs0.astype(mxu_dtype)

    # Conv1d(k=3, s=2): two MXU matmuls (K = 2C and K = C), f32 accumulation.
    acc = jnp.dot(lhs12, w12_ref[...], preferred_element_type=jnp.float32)
    acc = acc + jnp.dot(lhs0, w0_ref[...], preferred_element_type=jnp.float32)

    # Fused LayerNorm, single reduction pass (E[x], E[x^2]), f32, PyTorch eps.
    inv_n = 1.0 / acc.shape[-1]
    s1 = jnp.sum(acc, axis=-1, keepdims=True)
    s2 = jnp.sum(acc * acc, axis=-1, keepdims=True)
    mu = s1 * inv_n
    var = s2 * inv_n - mu * mu
    y = (acc - mu) * jax.lax.rsqrt(var + eps)
    y = y * g_ref[...] + b_ref[...]
    o_ref[0] = y.astype(o_ref.dtype)


def _choose_tile(l_out, tile_out, per_row_bytes, align, batch):
    """Pick the pair-rows-per-tile: VMEM-budgeted, halo-aligned, pad-avoiding."""
    budget = 16 * 1024 * 1024                       # activation working-set target
    cap = min(int(tile_out), max(align, budget // max(per_row_bytes, 1)))
    if batch == 1 and l_out > align:
        # Guarantee >= 2 L-tiles so both v7x TensorCores get work when B == 1.
        cap = min(cap, _round_up(-(-l_out // 2), align))
    cap = max(align, cap // align * align)
    l_out_a = _round_up(l_out, align)
    if cap >= l_out_a:
        return l_out_a
    best = 0
    for d in range(align, cap + 1, align):           # largest divisor of l_out <= cap
        if l_out % d == 0:
            best = d
    if best * 4 >= cap:                              # close enough to budget-optimal:
        return best                                  # no wrapper pad / output slice
    return cap


_HAS_PIPELINE_MODE = False
try:
    _HAS_PIPELINE_MODE = (hasattr(pl, "Buffered") and
                          "pipeline_mode" in inspect.signature(pl.BlockSpec).parameters)
except Exception:
    _HAS_PIPELINE_MODE = False


def _resident_spec(shape):
    """Full-array BlockSpec for grid-invariant operands (single-buffered if possible)."""
    idx = lambda b, l: (0,) * len(shape)
    if _HAS_PIPELINE_MODE:
        return pl.BlockSpec(shape, idx, pipeline_mode=pl.Buffered(1))
    return pl.BlockSpec(shape, idx)


def conv_downsampler(x, weight, gamma, beta, *, eps=1e-5, tile_out=1024,
                     mxu_dtype=None, out_dtype=None):
    """Fused ConvDownsampler forward.

    x      : (B, L, dim)       channels-last activations (the module's input);
                               pass bf16 activations for the bf16 end-to-end path
    weight : (2*dim, dim, 3)   Conv1d weight (O, I, K), no bias
    gamma  : (2*dim,)          LayerNorm weight
    beta   : (2*dim,)          LayerNorm bias
    returns: (B, ceil(L/2), 2*dim), dtype = out_dtype or x.dtype
    """
    B, L, C = x.shape
    C_out, C_w, K = weight.shape
    assert C_w == C and K == 3 and C_out == 2 * C, (weight.shape, x.shape)
    out_dtype = out_dtype or x.dtype

    in_sz = jnp.dtype(x.dtype).itemsize
    out_sz = jnp.dtype(out_dtype).itemsize
    align = 16 if in_sz <= 2 else 8                  # bf16 native sublane tile is 16

    L_out = (L + 1) // 2
    # double-buffered in/out rows + ~3 f32 full-tile temporaries per pair-row
    per_row = 2 * C * (2 * in_sz + 2 * out_sz + 12)
    tl = _choose_tile(L_out, tile_out, per_row, align, B)
    T_p = _round_up(L_out, tl)                       # padded number of pair-rows
    L_p = 2 * T_p

    if L_p != L:                                     # only for odd L / ragged tail
        x = jnp.pad(x, ((0, 0), (0, L_p - L), (0, 0)))
    # Free row-major reinterpretation: pair consecutive time steps (the stride 2).
    xr = x.reshape(B, T_p, 2 * C)                    # xr[b, t] = [x[b, 2t], x[b, 2t+1]]

    # (C_out, C, 3) -> per-tap (C, C_out); taps 1 & 2 fused into one K=2C matrix.
    compute_dtype = mxu_dtype if mxu_dtype is not None else x.dtype
    w_t = jnp.transpose(weight, (2, 1, 0)).astype(compute_dtype)   # (3, C, C_out)
    w0 = w_t[0]                                      # tap reading x[2t - 1]
    w12 = jnp.concatenate([w_t[1], w_t[2]], axis=0)  # (2C, C_out)
    g2 = gamma.reshape(1, C_out).astype(jnp.float32)
    b2 = beta.reshape(1, C_out).astype(jnp.float32)

    n_l = T_p // tl
    hpt = tl // align                                # halo blocks per L tile
    kernel = functools.partial(_conv_down_ln_kernel, c_in=C, eps=float(eps),
                               mxu_dtype=mxu_dtype)

    w_sz = jnp.dtype(compute_dtype).itemsize
    cost = pl.CostEstimate(
        flops=12 * B * L_out * C * C + 8 * B * L_out * C_out,
        transcendentals=B * L_out,
        bytes_accessed=(B * L * C * in_sz + B * L_out * C_out * out_sz
                        + 6 * C * C * w_sz + 2 * C_out * 4),
    )

    out = pl.pallas_call(
        kernel,
        out_shape=jax.ShapeDtypeStruct((B, T_p, C_out), out_dtype),
        grid_spec=pltpu.PrefetchScalarGridSpec(
            num_scalar_prefetch=0,
            grid=(B, n_l),
            in_specs=[
                # main input tile: pair-rows [l*tl, (l+1)*tl)
                pl.BlockSpec((1, tl, 2 * C), lambda b, l: (b, l, 0)),
                # halo: the `align` pair-rows just before the tile (clamped at
                # l == 0; the kernel masks that case -> the conv's left zero pad)
                pl.BlockSpec((1, align, 2 * C),
                             lambda b, l: (b, jnp.maximum(l * hpt - 1, 0), 0)),
                _resident_spec((2 * C, C_out)),
                _resident_spec((C, C_out)),
                _resident_spec((1, C_out)),
                _resident_spec((1, C_out)),
            ],
            out_specs=pl.BlockSpec((1, tl, C_out), lambda b, l: (b, l, 0)),
        ),
        compiler_params=pltpu.CompilerParams(
            dimension_semantics=("parallel", "parallel"),
            vmem_limit_bytes=32 * 1024 * 1024,
        ),
        cost_estimate=cost,
    )(xr, xr, w12, w0, g2, b2)

    if T_p != L_out:
        out = out[:, :L_out, :]
    return out


def reference_conv_downsampler(x, weight, gamma, beta, eps=1e-5):
    """Pure-JAX reference matching the PyTorch ConvDownsampler forward."""
    y = jax.lax.conv_general_dilated(
        jnp.transpose(x, (0, 2, 1)), weight,
        window_strides=(2,), padding=((1, 1),),
        dimension_numbers=("NCH", "OIH", "NCH"),
        precision=jax.lax.Precision.HIGHEST)
    y = jnp.transpose(y, (0, 2, 1))                  # (B, L_out, 2*dim)
    mu = jnp.mean(y, axis=-1, keepdims=True)
    var = jnp.mean((y - mu) ** 2, axis=-1, keepdims=True)
    return (y - mu) * jax.lax.rsqrt(var + eps) * gamma + beta


if __name__ == "__main__":
    key = jax.random.PRNGKey(0)

    # --- test 1: f32, single L tile, no wrapper pad/slice ---------------------
    B, dim, L = 2, 32, 16
    k1, k2, k3, k4, key = jax.random.split(key, 5)
    x = jax.random.normal(k1, (B, L, dim), jnp.float32)
    bound = 1.0 / (dim * 3) ** 0.5
    w = jax.random.uniform(k2, (2 * dim, dim, 3), jnp.float32, -bound, bound)
    gamma = jax.random.uniform(k3, (2 * dim,), jnp.float32, 0.5, 1.5)
    beta = jax.random.uniform(k4, (2 * dim,), jnp.float32, -0.5, 0.5)

    out = jax.block_until_ready(conv_downsampler(x, w, gamma, beta))
    ref = reference_conv_downsampler(x, w, gamma, beta)
    assert out.shape == (B, (L + 1) // 2, 2 * dim), out.shape
    assert jnp.allclose(out, ref, atol=2e-4, rtol=2e-4), \
        float(jnp.max(jnp.abs(out - ref)))

    # --- test 2: f32, multi-tile L (cross-tile halo), odd L (right pad), tiny dim
    B2, dim2, L2 = 2, 4, 19
    k1, k2, key = jax.random.split(key, 3)
    x2 = jax.random.normal(k1, (B2, L2, dim2), jnp.float32)
    bound2 = 1.0 / (dim2 * 3) ** 0.5
    w2 = jax.random.uniform(k2, (2 * dim2, dim2, 3), jnp.float32, -bound2, bound2)
    g2 = jnp.ones((2 * dim2,), jnp.float32)
    b2 = jnp.zeros((2 * dim2,), jnp.float32)

    out2 = jax.block_until_ready(conv_downsampler(x2, w2, g2, b2, tile_out=8))
    ref2 = reference_conv_downsampler(x2, w2, g2, b2)
    assert out2.shape == (B2, 10, 2 * dim2), out2.shape
    assert jnp.allclose(out2, ref2, atol=2e-4, rtol=2e-4), \
        float(jnp.max(jnp.abs(out2 - ref2)))

    # --- test 3: bf16 end-to-end, B=1 (TC split on L), 16-row halo, multi-tile -
    B3, dim3, L3 = 1, 64, 128
    k1, k2, k3, k4, key = jax.random.split(key, 5)
    bound3 = 1.0 / (dim3 * 3) ** 0.5
    x3 = jax.random.normal(k1, (B3, L3, dim3), jnp.float32).astype(jnp.bfloat16)
    w3 = jax.random.uniform(k2, (2 * dim3, dim3, 3), jnp.float32,
                            -bound3, bound3).astype(jnp.bfloat16)
    g3 = jax.random.uniform(k3, (2 * dim3,), jnp.float32, 0.5, 1.5)
    b3 = jax.random.uniform(k4, (2 * dim3,), jnp.float32, -0.5, 0.5)

    out3 = jax.block_until_ready(conv_downsampler(x3, w3, g3, b3))
    assert out3.dtype == jnp.bfloat16 and out3.shape == (B3, L3 // 2, 2 * dim3)
    ref3 = reference_conv_downsampler(x3.astype(jnp.float32),
                                      w3.astype(jnp.float32), g3, b3)
    assert jnp.allclose(out3.astype(jnp.float32), ref3, atol=5e-2, rtol=5e-2), \
        float(jnp.max(jnp.abs(out3.astype(jnp.float32) - ref3)))

    # --- test 4: f32 I/O with bf16 MXU operands (mxu_dtype path) ---------------
    out4 = jax.block_until_ready(
        conv_downsampler(x, w, gamma, beta, mxu_dtype=jnp.bfloat16))
    ref4 = reference_conv_downsampler(
        x.astype(jnp.bfloat16).astype(jnp.float32),
        w.astype(jnp.bfloat16).astype(jnp.float32), gamma, beta)
    assert jnp.allclose(out4, ref4, atol=5e-3, rtol=5e-3), \
        float(jnp.max(jnp.abs(out4 - ref4)))

    print("KERNEL_OK")
</pallas_src>

<mosaic_0001>
module attributes {stable_mosaic.version = 11 : i64} {
  func.func @_conv_down_ln_kernel(%arg0: i32, %arg1: i32, %arg2: memref<1x8x64xf32, #tpu.memory_space<vmem>>, %arg3: memref<1x8x64xf32, #tpu.memory_space<vmem>>, %arg4: memref<64x64xf32, #tpu.memory_space<vmem>>, %arg5: memref<32x64xf32, #tpu.memory_space<vmem>>, %arg6: memref<1x64xf32, #tpu.memory_space<vmem>>, %arg7: memref<1x64xf32, #tpu.memory_space<vmem>>, %arg8: memref<1x8x64xf32, #tpu.memory_space<vmem>>) attributes {dimension_semantics = [#tpu.dimension_semantics<parallel>, #tpu.dimension_semantics<parallel>], iteration_bounds = array<i64: 2, 1>, scalar_prefetch = 0 : i64, scratch_operands = 0 : i64, tpu.core_type = #tpu.core_type<tc>, window_params = [{transform_indices = @transform_0, window_bounds = array<i64: 1, 8, 64>}, {transform_indices = @transform_1, window_bounds = array<i64: 1, 8, 64>}, {pipeline_mode = #tpu.pipeline_mode<synchronous>, transform_indices = @transform_2, window_bounds = array<i64: 64, 64>}, {pipeline_mode = #tpu.pipeline_mode<synchronous>, transform_indices = @transform_3, window_bounds = array<i64: 32, 64>}, {pipeline_mode = #tpu.pipeline_mode<synchronous>, transform_indices = @transform_4, window_bounds = array<i64: 1, 64>}, {pipeline_mode = #tpu.pipeline_mode<synchronous>, transform_indices = @transform_5, window_bounds = array<i64: 1, 64>}, {transform_indices = @transform_6, window_bounds = array<i64: 1, 8, 64>}]} {
    %c0 = arith.constant 0 : index
    %c0_0 = arith.constant 0 : index
    %c0_1 = arith.constant 0 : index
    %0 = vector.load %arg2[%c0, %c0_0, %c0_1] : memref<1x8x64xf32, #tpu.memory_space<vmem>>, vector<1x8x64xf32>
    %1 = vector.shape_cast %0 : vector<1x8x64xf32> to vector<8x64xf32>
    %2 = vector.extract_strided_slice %1 {offsets = [0, 32], sizes = [8, 32], strides = [1, 1]} : vector<8x64xf32> to vector<8x32xf32>
    %c0_2 = arith.constant 0 : index
    %c7 = arith.constant 7 : index
    %c32 = arith.constant 32 : index
    %3 = vector.load %arg3[%c0_2, %c7, %c32] : memref<1x8x64xf32, #tpu.memory_space<vmem>>, vector<1x1x32xf32>
    %4 = vector.shape_cast %3 : vector<1x1x32xf32> to vector<1x32xf32>
    %c0_i32 = arith.constant 0 : i32
    %5 = arith.cmpi sgt, %arg1, %c0_i32 : i32
    %cst = arith.constant 0.000000e+00 : f32
    %6 = vector.broadcast %cst : f32 to vector<1x32xf32>
    %7 = arith.select %5, %4, %6 : vector<1x32xf32>
    %c1_i32 = arith.constant 1 : i32
    %8 = tpu.dynamic_rotate %2 by %c1_i32 dim 0 : vector<8x32xf32>, i32 -> vector<8x32xf32>
    %9 = tpu.iota {dimensions = array<i32: 0>} : vector<8x32xi32>
    %c0_i32_3 = arith.constant 0 : i32
    %10 = vector.broadcast %c0_i32_3 : i32 to vector<8x32xi32>
    %11 = arith.cmpi eq, %9, %10 : vector<8x32xi32>
    %12 = vector.shape_cast %7 : vector<1x32xf32> to vector<1x32xf32>
    %13 = vector.broadcast %12 : vector<1x32xf32> to vector<8x32xf32>
    %14 = arith.select %11, %13, %8 : vector<8x32xi1>, vector<8x32xf32>
    %c0_4 = arith.constant 0 : index
    %c0_5 = arith.constant 0 : index
    %15 = vector.load %arg4[%c0_4, %c0_5] : memref<64x64xf32, #tpu.memory_space<vmem>>, vector<64x64xf32>
    %cst_6 = arith.constant dense<0.000000e+00> : vector<8x64xf32>
    %16 = tpu.matmul %1, %15, %cst_6 {dimension_numbers = #tpu.dot_dimension_numbers<[1], [0], [0], [1], [0, 0, 1, 1], [], []>} : vector<8x64xf32>, vector<64x64xf32>, vector<8x64xf32> -> vector<8x64xf32>
    %c0_7 = arith.constant 0 : index
    %c0_8 = arith.constant 0 : index
    %17 = vector.load %arg5[%c0_7, %c0_8] : memref<32x64xf32, #tpu.memory_space<vmem>>, vector<32x64xf32>
    %cst_9 = arith.constant dense<0.000000e+00> : vector<8x64xf32>
    %18 = tpu.matmul %14, %17, %cst_9 {dimension_numbers = #tpu.dot_dimension_numbers<[1], [0], [0], [1], [0, 0, 1, 1], [], []>} : vector<8x32xf32>, vector<32x64xf32>, vector<8x64xf32> -> vector<8x64xf32>
    %19 = arith.addf %16, %18 : vector<8x64xf32>
    %cst_10 = arith.constant dense<0.000000e+00> : vector<8xf32>
    %20 = vector.multi_reduction <add>, %19, %cst_10 [1] : vector<8x64xf32> to vector<8xf32>
    %21 = vector.shape_cast %20 : vector<8xf32> to vector<8x1xf32>
    %22 = arith.mulf %19, %19 : vector<8x64xf32>
    %cst_11 = arith.constant dense<0.000000e+00> : vector<8xf32>
    %23 = vector.multi_reduction <add>, %22, %cst_11 [1] : vector<8x64xf32> to vector<8xf32>
    %24 = vector.shape_cast %23 : vector<8xf32> to vector<8x1xf32>
    %cst_12 = arith.constant 1.562500e-02 : f32
    %25 = vector.broadcast %cst_12 : f32 to vector<8x1xf32>
    %26 = arith.mulf %21, %25 : vector<8x1xf32>
    %cst_13 = arith.constant 1.562500e-02 : f32
    %27 = vector.broadcast %cst_13 : f32 to vector<8x1xf32>
    %28 = arith.mulf %24, %27 : vector<8x1xf32>
    %29 = arith.mulf %26, %26 : vector<8x1xf32>
    %30 = arith.subf %28, %29 : vector<8x1xf32>
    %31 = vector.broadcast %26 : vector<8x1xf32> to vector<8x64xf32>
    %32 = arith.subf %19, %31 : vector<8x64xf32>
    %cst_14 = arith.constant 9.99999974E-6 : f32
    %33 = vector.broadcast %cst_14 : f32 to vector<8x1xf32>
    %34 = arith.addf %30, %33 : vector<8x1xf32>
    %35 = math.rsqrt %34 : vector<8x1xf32>
    %36 = vector.broadcast %35 : vector<8x1xf32> to vector<8x64xf32>
    %37 = arith.mulf %32, %36 : vector<8x64xf32>
    %c0_15 = arith.constant 0 : index
    %c0_16 = arith.constant 0 : index
    %38 = vector.load %arg6[%c0_15, %c0_16] : memref<1x64xf32, #tpu.memory_space<vmem>>, vector<1x64xf32>
    %39 = vector.broadcast %38 : vector<1x64xf32> to vector<8x64xf32>
    %40 = arith.mulf %37, %39 : vector<8x64xf32>
    %c0_17 = arith.constant 0 : index
    %c0_18 = arith.constant 0 : index
    %41 = vector.load %arg7[%c0_17, %c0_18] : memref<1x64xf32, #tpu.memory_space<vmem>>, vector<1x64xf32>
    %42 = vector.broadcast %41 : vector<1x64xf32> to vector<8x64xf32>
    %43 = arith.addf %40, %42 : vector<8x64xf32>
    %c0_19 = arith.constant 0 : index
    %c0_20 = arith.constant 0 : index
    %c0_21 = arith.constant 0 : index
    %44 = vector.load %arg8[%c0_19, %c0_20, %c0_21] : memref<1x8x64xf32, #tpu.memory_space<vmem>>, vector<1x8x64xf32>
    %45 = vector.shape_cast %44 : vector<1x8x64xf32> to vector<8x64xf32>
    %46 = vector.shape_cast %43 : vector<8x64xf32> to vector<1x8x64xf32>
    tpu.vector_store %arg8[%c0_19, %c0_20, %c0_21], %46 {strides = array<i32>} : memref<1x8x64xf32, #tpu.memory_space<vmem>>, vector<1x8x64xf32>,
    return
  }
  func.func @transform_0(%arg0: i32, %arg1: i32) -> (i32, i32, i32) {
    %c0_i32 = arith.constant 0 : i32
    %c0_i32_0 = arith.constant 0 : i32
    return %arg0, %arg1, %c0_i32 : i32, i32, i32
  }
  func.func @transform_1(%arg0: i32, %arg1: i32) -> (i32, i32, i32) {
    %c1_i32 = arith.constant 1 : i32
    %0 = arith.muli %arg1, %c1_i32 : i32
    %c1_i32_0 = arith.constant 1 : i32
    %1 = arith.subi %0, %c1_i32_0 : i32
    %c0_i32 = arith.constant 0 : i32
    %2 = arith.maxsi %1, %c0_i32 : i32
    %c0_i32_1 = arith.constant 0 : i32
    %c0_i32_2 = arith.constant 0 : i32
    return %arg0, %2, %c0_i32_1 : i32, i32, i32
  }
  func.func @transform_2(%arg0: i32, %arg1: i32) -> (i32, i32) {
    %c0_i32 = arith.constant 0 : i32
    %c0_i32_0 = arith.constant 0 : i32
    %c0_i32_1 = arith.constant 0 : i32
    return %c0_i32, %c0_i32_0 : i32, i32
  }
  func.func @transform_3(%arg0: i32, %arg1: i32) -> (i32, i32) {
    %c0_i32 = arith.constant 0 : i32
    %c0_i32_0 = arith.constant 0 : i32
    %c0_i32_1 = arith.constant 0 : i32
    return %c0_i32, %c0_i32_0 : i32, i32
  }
  func.func @transform_4(%arg0: i32, %arg1: i32) -> (i32, i32) {
    %c0_i32 = arith.constant 0 : i32
    %c0_i32_0 = arith.constant 0 : i32
    %c0_i32_1 = arith.constant 0 : i32
    return %c0_i32, %c0_i32_0 : i32, i32
  }
  func.func @transform_5(%arg0: i32, %arg1: i32) -> (i32, i32) {
    %c0_i32 = arith.constant 0 : i32
    %c0_i32_0 = arith.constant 0 : i32
    %c0_i32_1 = arith.constant 0 : i32
    return %c0_i32, %c0_i32_0 : i32, i32
  }
  func.func @transform_6(%arg0: i32, %arg1: i32) -> (i32, i32, i32) {
    %c0_i32 = arith.constant 0 : i32
    %c0_i32_0 = arith.constant 0 : i32
    return %arg0, %arg1, %c0_i32 : i32, i32, i32
  }
}

</mosaic_0001>

<bundles_post_ra>
// kernel: tpu_custom_call.1
= control target key start
LH: loop header
LB: loop body
LE: loop exit
PB: predicated region body
PF: predicated region fallthrough
CT: control target
= control target key end

     0   :  { %s1463_s0 = inlined_call_operand.hbm [shape: f32[2,8,64], index: 0, kind: input, shape index: {}]   ;;  %s1464_s1 = inlined_call_operand.hbm [shape: f32[2,8,64], index: 1, kind: input, shape index: {}]   ;;  %s1465_s2 = inlined_call_operand.hbm [shape: f32[64,64], index: 2, kind: input, shape index: {}]   ;;  %s1466_s3 = inlined_call_operand.hbm [shape: f32[32,64], index: 3, kind: input, shape index: {}]   ;;  %s1467_s4 = inlined_call_operand.vmem [shape: f32[1,64], index: 4, kind: input, shape index: {}]   ;;  %s1468_s5 = inlined_call_operand.vmem [shape: f32[1,64], index: 5, kind: input, shape index: {}]   ;;  %s1469_s6 = inlined_call_operand.hbm [shape: f32[2,8,64], index: 6, kind: output, shape index: {}]  }
   0x1   :  { %1476 = sst [smem:[#allocation19_spill]] %s1465_s2 }
   0x2   :  { %1477 = sst [smem:[#allocation20_spill]] %s1466_s3 }
   0x3   :  { %11 = vsyncpa [#allocation3], 0 }
   0x4   :  { %13 = vsyncpa [#allocation3 + $0x1], 0 }
   0x5   :  { %14 = vsyncpa [#allocation6], 0 }
   0x6   :  { %16 = vsyncpa [#allocation6 + $0x1], 0 }
   0x7   :  { %17 = vsyncpa [#allocation9], 0 }
   0x8   :  { %18 = vsyncpa [#allocation4], 0 }
   0x9   :  { %20 = vsyncpa [#allocation4 + $0x1], 0  ;;  %s1163_s21 = smov 0   ;;  %s1165_s22 = smov 0  }
   0xa   :  { %s1167_s23 = smov 0   ;;  %s1169_s24 = smov 0  }
   0xb   :  { %s1171_s25 = smov 0   ;;  %s1173_s26 = smov 0  }
   0xc LB: > { %1478 = sst [smem:[#allocation16_spill]] %s1110_s25  ;;  %s1194_s27 = sadd.s32 4294967295, %s1114_s26   ;;  %s1114_s26 = sphi %s1173_s26, %s26_s26   ;;  %s1110_s25 = sphi %s1171_s25, %s1501_s25   ;;  %s1106_s24 = sphi %s1169_s24, %s1500_s24   ;;  %s1102_s23 = sphi %s1167_s23, %s1504_s23   ;;  %s1098_s22 = sphi %s1165_s22, %s1503_s22   ;;  %s1094_s21 = sphi %s1163_s21, %s1502_s21  }
   0xd   : > { %s721_s28 = sadd.s32 4294967294, %s1114_s26   ;;  %p60_p0 = scmp.ne.s32.totalorder %s1098_s22, %s1094_s21 }
   0xe   : > { %p1470_p1 = scmp.eq.s32.totalorder %s1194_s27, 0  ;;  %p210_p3 = scmp.eq.s32.totalorder %s721_s28, 1 }
   0xf   : > { %p722_p5 = scmp.ge.s32.totalorder %s1114_s26, 1  ;;  %p217_p7 = scmp.lt.s32.totalorder %s1114_s26, 3 }
  0x10   : > { %p1203_p4 = por %p1470_p1, %p60_p0  ;;  %p1208_p6 = por %p210_p3, %p60_p0 }
  0x11   : > { %p1213_p8 = pnand %p722_p5, %p217_p7  ;;  %s1116_s8 = smov [#allocation7]  }
  0x12   : > { %s1479_s29 = scalar_select %p1203_p4, 1, 0 }
  0x13   : > { %s1480_s30 = scalar_select %p1208_p6, 1, 0 }
  0x14   : > { %s1481_s7 = scalar_select %p1213_p8, 1, 0 }
  0x15   : > { %s229_s9 = sshll.u32 %s1116_s8, 4  ;;  %p821_p9 = pneg %p1213_p8  ;;  %s1217_s9 = int_to_ptr.vmem [resolvable:$true] %s229_s9 }
  0x16   : > { %s1117_s11 = smov [#allocation8]   ;;  %s1483_s2 = sld [smem:[#allocation19_spill]] }
  0x17   : > { %p1224_p11 = pnand %p821_p9, %p1470_p1  ;;  %s242_s12 = sshll.u32 %s1117_s11, 4  ;;  %s1228_s12 = int_to_ptr.vmem [resolvable:$true] %s242_s12 }
  0x19   : > { %p906_p13 = pneg %p1224_p11 }
  0x1c   : > { %s904_s15 = scalar_lea.hbm %s1483_s2, 1024 }
  0x1d   : > { %p905_p12 = scmp.ne.s32.totalorder %s1483_s2, %s904_s15  ;;  %p911_p5 = scmp.lt.u32.totalorder %s904_s15, %s1483_s2 }
  0x1f   : > { %p907_p0 = pnand %p906_p13, %p905_p12 }
  0x21   : > { %p908_p3 = pneg %p907_p0 }
  0x23   : > { %p913_p7 = pnand %p911_p5, %p908_p3 }
  0x25   : > { %916 = shalt.err (!%p913_p7)
}
  0x26   : > { %s917_s20 = scalar_lea.vmem %s1217_s9, 1024  ;;  %p925_p2 = scmp.lt.s32.totalorder %s1217_s9, %s1217_s9 }
  0x27   : > { %p918_p9 = scmp.ne.s32.totalorder %s1217_s9, %s917_s20  ;;  %p926_p12 = scmp.lt.s32.totalorder %s917_s20, %s917_s20 }
  0x29   : > { %p920_p10 = pnand %p918_p9, %p906_p13  ;;  %p927_p0 = por %p926_p12, %p925_p2 }
  0x2b   : > { %p921_p1 = pneg %p920_p10 }
  0x2d   : > { %p928_p6 = pnand %p927_p0, %p921_p1 }
  0x2f   : > { %931 = shalt.err (!%p928_p6)
}
  0x30   : > { %s1118_s28 = smov 128   ;;  %s1119_s8 = smov 8  }
  0x31   : > { %824 = dma.hbm_to_vmem [thread:$0]  (!%p1224_p11), %s1483_s2, 1024, %s1217_s9, [#allocation6], %s1118_s28, %s1118_s28, %s1119_s8  }
  0x32   : > { %s1484_s3 = sld [smem:[#allocation20_spill]] }
  0x38   : > { %s932_s16 = scalar_lea.hbm %s1484_s3, 512 }
  0x39   : > { %p933_p2 = scmp.ne.s32.totalorder %s1484_s3, %s932_s16  ;;  %p939_p10 = scmp.lt.u32.totalorder %s932_s16, %s1484_s3 }
  0x3b   : > { %p935_p1 = pnand %p933_p2, %p906_p13 }
  0x3d   : > { %p936_p6 = pneg %p935_p1 }
  0x3f   : > { %p941_p3 = pnand %p939_p10, %p936_p6 }
  0x41   : > { %944 = shalt.err (!%p941_p3)
}
  0x42   : > { %s945_s9 = scalar_lea.vmem %s1228_s12, 512  ;;  %p953_p12 = scmp.lt.s32.totalorder %s1228_s12, %s1228_s12 }
  0x43   : > { %p946_p5 = scmp.ne.s32.totalorder %s1228_s12, %s945_s9  ;;  %p954_p0 = scmp.lt.s32.totalorder %s945_s9, %s945_s9 }
  0x45   : > { %p948_p7 = pnand %p946_p5, %p906_p13  ;;  %p955_p2 = por %p954_p0, %p953_p12 }
  0x47   : > { %p949_p9 = pneg %p948_p7 }
  0x49   : > { %p956_p1 = pnand %p955_p2, %p949_p9 }
  0x4b   : > { %959 = shalt.err (!%p956_p1)
}
  0x4c   : > { %827 = dma.hbm_to_vmem [thread:$0]  (!%p1224_p11), %s1484_s3, 512, %s1228_s12, [#allocation9], %s1118_s28, %s1118_s28, %s1119_s8  }
  0x4d   : > { %s38_s14 = sadd.s32 1, %s1110_s25  ;;  %s47_s15 = sadd.s32 1, %s1102_s23 }
  0x4e   : > { %p40_p13 = scmp.ge.s32.totalorder %s38_s14, 2  ;;  %p54_p6 = scmp.ne.s32.totalorder %s1102_s23, %s1098_s22 }
  0x4f   : > { %p55_p10 = scmp.eq.s32.totalorder %s1114_s26, 0  ;;  %p841_p3 = scmp.lt.s32.totalorder %s1114_s26, 2 }
  0x50   : > { %s1506_s14 = smov (%p40_p13, %s38_s14), 0  ;;  %p1486_p7 = scmp.eq.s32.totalorder %s1194_s27, 1 }
  0x51   : > { %1485 = sst [smem:[#allocation17_spill]] %s1506_s14  ;;  %p56_p5 = por %p55_p10, %p54_p6 }
  0x52   : > { %p1292_p9 = por %p1486_p7, %p54_p6  ;;  %s42_s16 = ssub.s32 %s1110_s25, %s1506_s14 }
  0x53   : > { %s262_s17 = sand.u32 1, %s1102_s23   ;;  %p45_p12 = scmp.eq.s32.totalorder %s42_s16, 0 }
  0x54   : > { %s1487_s10 = scalar_select %p1292_p9, 1, 0 }
  0x55   : > { %s1299_s12 = sshll.u32 %s262_s17, 3  ;;  %s727_s28 = sshll.u32 %s1110_s25, 7 }
  0x56   : > { %s1303_s8 = scalar_select %p45_p12, %s1102_s23, %s47_s15  }
  0x57   : > { %s1308_s20 = scalar_lea.hbm %s1463_s0, %s727_s28  ;;  %s266_s9 = scalar_lea.vmem [#allocation2], %s1299_s12 }
  0x58   : > { %1488 = sst [smem:[#allocation18_spill]] %s1303_s8  ;;  %s274_s11 = sshll.u32 %s266_s9, 4  ;;  %s1317_s11 = int_to_ptr.vmem [resolvable:$true] %s274_s11 }
  0x59   : > { %p1313_p11 = pnand %p841_p3, %p56_p5  ;;  %s1322_s18 = scalar_lea.hbm %s1464_s1, %s727_s28 }
  0x5a   : > { %s263_s19 = scalar_lea.sflag [#allocation3], %s262_s17  ;;  %s960_s2 = scalar_lea.hbm %s1308_s20, 128 }
  0x5b   : > { %p961_p0 = scmp.ne.s32.totalorder %s1308_s20, %s960_s2  ;;  %p962_p2 = pneg %p1313_p11 }
  0x5c   : > { %s965_s14 = scalar_lea.hbm %s1463_s0, 256  ;;  %p966_p6 = scmp.lt.u32.totalorder %s1308_s20, %s1463_s0 }
  0x5d   : > { %p963_p1 = pnand %p962_p2, %p961_p0  ;;  %p967_p10 = scmp.lt.u32.totalorder %s965_s14, %s960_s2 }
  0x5e   : > { %p969_p5 = scmp.lt.u32.totalorder %s960_s2, %s1308_s20 }
  0x5f   : > { %p964_p13 = pneg %p963_p1  ;;  %p968_p3 = por %p967_p10, %p966_p6 }
  0x61   : > { %p970_p7 = por %p969_p5, %p968_p3 }
  0x63   : > { %p971_p12 = pnand %p970_p7, %p964_p13 }
  0x65   : > { %974 = shalt.err (!%p971_p12)
}
  0x66   : > { %s975_s17 = scalar_lea.vmem %s1317_s11, 128  ;;  %s1120_s3 = smov [#allocation2]  }
  0x67   : > { %p976_p0 = scmp.ne.s32.totalorder %s1317_s11, %s975_s17  ;;  %s980_s28 = sshll.u32 %s1120_s3, 4  ;;  %s981_s28 = int_to_ptr.vmem [resolvable:$false] %s980_s28 }
  0x68   : > { %s982_s25 = scalar_lea.vmem %s981_s28, 256  ;;  %p983_p4 = scmp.lt.s32.totalorder %s1317_s11, %s981_s28 }
  0x69   : > { %p978_p1 = pnand %p976_p0, %p962_p2  ;;  %p984_p6 = scmp.lt.s32.totalorder %s982_s25, %s975_s17 }
  0x6b   : > { %p979_p9 = pneg %p978_p1  ;;  %p985_p10 = por %p984_p6, %p983_p4 }
  0x6d   : > { %p986_p3 = pnand %p985_p10, %p979_p9 }
  0x6f   : > { %989 = shalt.err (!%p986_p3)
}
  0x70   : > { %831 = dma.hbm_to_vmem [thread:$0]  (!%p1313_p11), %s1308_s20, 128, %s1317_s11, %s263_s19  }
  0x71   : > { %s281_s2 = sand.u32 1, %s1114_s26   ;;  %s285_s14 = scalar_lea.vmem [#allocation5], %s1299_s12 }
  0x72   : > { %s296_s8 = sshll.u32 %s285_s14, 4  ;;  %s282_s15 = scalar_lea.sflag [#allocation6], %s281_s2  ;;  %s297_s8 = int_to_ptr.vmem [resolvable:$true] %s296_s8 }
  0x73   : > { %s990_s16 = scalar_lea.hbm %s1322_s18, 128  ;;  %s995_s3 = scalar_lea.hbm %s1464_s1, 256 }
  0x74   : > { %p991_p4 = scmp.ne.s32.totalorder %s1322_s18, %s990_s16  ;;  %p996_p5 = scmp.lt.u32.totalorder %s1322_s18, %s1464_s1 }
  0x75   : > { %p997_p7 = scmp.lt.u32.totalorder %s995_s3, %s990_s16  ;;  %p999_p0 = scmp.lt.u32.totalorder %s990_s16, %s1322_s18 }
  0x76   : > { %p993_p9 = pnand %p991_p4, %p962_p2 }
  0x77   : > { %p998_p12 = por %p997_p7, %p996_p5 }
  0x78   : > { %p994_p13 = pneg %p993_p9 }
  0x79   : > { %p1000_p1 = por %p999_p0, %p998_p12 }
  0x7b   : > { %p1001_p6 = pnand %p1000_p1, %p994_p13 }
  0x7d   : > { %1004 = shalt.err (!%p1001_p6)
}
  0x7e   : > { %s1005_s12 = scalar_lea.vmem %s297_s8, 128  ;;  %s1121_s20 = smov [#allocation5]  }
  0x7f   : > { %p1006_p10 = scmp.ne.s32.totalorder %s297_s8, %s1005_s12  ;;  %s1010_s11 = sshll.u32 %s1121_s20, 4  ;;  %s1011_s11 = int_to_ptr.vmem [resolvable:$false] %s1010_s11 }
  0x80   : > { %s1012_s19 = scalar_lea.vmem %s1011_s11, 256  ;;  %p1013_p9 = scmp.lt.s32.totalorder %s297_s8, %s1011_s11 }
  0x81   : > { %p1008_p3 = pnand %p1006_p10, %p962_p2  ;;  %p1014_p8 = scmp.lt.s32.totalorder %s1012_s19, %s1005_s12 }
  0x83   : > { %p1009_p4 = pneg %p1008_p3  ;;  %p1015_p5 = por %p1014_p8, %p1013_p9 }
  0x85   : > { %p1016_p7 = pnand %p1015_p5, %p1009_p4 }
  0x87   : > { %1019 = shalt.err (!%p1016_p7)
}
  0x88   : > { %834 = dma.hbm_to_vmem [thread:$0]  (!%p1313_p11), %s1322_s18, 128, %s297_s8, %s282_s15  }
  0x89   : > { %p1490_p13 = scmp.ne.s32.totalorder %s1481_s7, 0 }
  0x8a   : > { %s1373_s2 = sand.u32 (!%p1490_p13), 1, %s1098_s22   ;;  %p1491_p8 = scmp.ne.s32.totalorder (!%p1490_p13), %s1479_s29, 0 }
  0x8b   : > { %305 = sbr.rel (%p1490_p13) target bundleno = 902 (0x386), region = 44  ;;  %s731_s14 = sshll.u32 (!%p1490_p13), %s1373_s2, 3 }
  0x8c   : > { %s308_s16 = scalar_lea.sflag (!%p1490_p13), [#allocation3], %s1373_s2  ;;  %s311_s9 = scalar_lea.vmem (!%p1490_p13), [#allocation2], %s731_s14 }
  0x92   : > { %1073 = dma.done.wait (%p1491_p8), %s308_s16, 128  }
  0x93   : > { %1075 = vsyncadd (%p1491_p8), %s308_s16, 4294967168  ;;  %s316_s7 = sand.u32 1, %s1194_s27  }
  0x94   : > { %s317_s13 = scalar_lea.sflag [#allocation6], %s316_s7 }
  0x95   : > { %1077 = dma.done.wait (%p1491_p8), %s317_s13, 128  }
  0x96   : > { %1079 = vsyncadd (%p1491_p8), %s317_s13, 4294967168  ;;  %p1492_p11 = scmp.eq.s32.totalorder %s1194_s27, 0 }
  0x98   : > { %1081 = dma.done.wait (%p1492_p11), [#allocation6], 1024   ;;  %p1493_p2 = pmov %p1492_p11 }
  0x9a   : > { %1083 = vsyncadd (%p1493_p2), [#allocation6], 4294966272  ;;  %p1494_p12 = pmov %p1493_p2 }
  0x9b   : > { %p1495_p0 = pmov %p1493_p2 }
  0x9c   : > { %1085 = dma.done.wait (%p1494_p12), [#allocation9], 512  }
  0x9d   : > { %1087 = vsyncadd (%p1495_p0), [#allocation9], 4294966784  ;;  %v365_v0 = vld [vmem:[%s311_s9] sm:$0xff]  ;;  %s1122_s18 = smov 96   ;;  %v391_v3 = vld [vmem:[#allocation7 + $0x10] sm:$0xff]  ;;  %v1123_v4 = vmov 0.0|0.0   ;;  %v377_v23 = vlaneseq }
  0x9e   : > { %373 = vrot.lane.b32.xlu0 %v365_v0, %s1122_s18  ;;  %v389_v1 = vld [vmem:[#allocation7] sm:$0xff]  ;;  %v390_v2 = vld [vmem:[#allocation7 + $0x8] sm:$0xff]  ;;  %794 = vmatprep.subr.bf16.mxu0 %v1123_v4  ;;  %v392_v6 = vld [vmem:[#allocation7 + $0x18] sm:$0xff]  ;;  %vm1124_vm0 = vmmov 0   ;;  %v1125_v9 = vmov 0.0   ;;  %s1126_s27 = smov 32  }
  0x9f   : > { %v795_v5 = vpack.c.bf16 %v390_v2, %v389_v1  ;;  %788 = vmatprep.subr.bf16.mxu1 %v1123_v4  ;;  %v397_v7 = vld [vmem:[#allocation8] sm:$0xff]  ;;  %v398_v8 = vld [vmem:[#allocation8 + $0x8] sm:$0xff]  ;;  %785 = vmatprep.mubr.msk.f32.mxu0 %vm1124_vm0, %v1125_v9  ;;  %v798_v10 = vpack.c.bf16 %v392_v6, %v391_v3  ;;  %v399_v12 = vld [vmem:[#allocation8 + $0x10] sm:$0xff]  ;;  %vm477_vm1 = vcmask 523264   ;;  %v378_v24 = vshrl.u32 %v377_v23, 7  ;;  %s741_s3 = sshll.u32 %s1106_s24, 7 }
  0xa0   : > { %766 = vmatprep.mubr.msk.f32.mxu1 %vm1124_vm0, %v1125_v9  ;;  %v789_v11 = vpack.c.bf16 %v398_v8, %v397_v7  ;;  %v400_v13 = vld [vmem:[#allocation8 + $0x18] sm:$0xff]  ;;  %v393_v14 = vld [vmem:[#allocation7 + $0x20] sm:$0xff]  ;;  %v394_v15 = vld [vmem:[#allocation7 + $0x28] sm:$0xff]  ;;  %vm404_vm3 = vcmask 261120   ;;  %s361_s28 = scalar_lea.vmem [#allocation10], %s731_s14  ;;  %s1413_s11 = scalar_lea.hbm %s1469_s6, %s741_s3 }
  0xa1   : > { %796 = vmatpush3.bf16.msra.mxu0 %v795_v5  ;;  %v792_v16 = vpack.c.bf16 %v400_v13, %v399_v12  ;;  %v801_v17 = vpack.c.bf16 %v394_v15, %v393_v14  ;;  %v395_v18 = vld [vmem:[#allocation7 + $0x30] sm:$0xff]  ;;  %v396_v19 = vld [vmem:[#allocation7 + $0x38] sm:$0xff]  ;;  %v382_v25 = vsub.s32 0, %v378_v24  ;;  %vm379_vm2 = vcmp.eq.s32.totalorder %v378_v24, 0  ;;  %v738_v47 = vld [vmem:[%s1467_s4] ss:$0 sm:$0xff] }
  0xa2   : > { %797 = vmatprep.subr.bf16.mxu0 %v1123_v4  ;;  %790 = vmatpush3.bf16.msra.mxu1 %v789_v11  ;;  %v804_v22 = vpack.c.bf16 %v396_v19, %v395_v18  ;;  %v739_v49 = vld [vmem:[%s1468_s5] ss:$0 sm:$0xff]  ;;  %s597_s25 = sshll.u32 %s361_s28, 4  ;;  %s583_s19 = scalar_lea.sflag [#allocation4], %s1373_s2  ;;  %s1415_s25 = int_to_ptr.vmem [resolvable:$true] %s597_s25 }
  0xa3   : > { %791 = vmatprep.subr.bf16.mxu1 %v1123_v4  ;;  %v383_v26 = vrot.slane %v1125_v9, %v382_v25  ;;  %s1020_s16 = scalar_lea.vmem %s1415_s25, 128  ;;  %p1496_p6 = scmp.ne.s32.totalorder %s1487_s10, 0 }
  0xa4   : > { %p1021_p1 = scmp.ne.s32.totalorder %s1415_s25, %s1020_s16  ;;  %s1127_s24 = smov [#allocation10]  }
  0xa5   : > { %799 = vmatpush3.bf16.msra.mxu0 %v798_v10  ;;  %s1024_s14 = sshll.u32 %s1127_s24, 4  ;;  %s1025_s14 = int_to_ptr.vmem [resolvable:$false] %s1024_s14 }
  0xa6   : > { %800 = vmatprep.subr.bf16.mxu0 %v1123_v4  ;;  %793 = vmatpush3.bf16.msra.mxu1 %v792_v16  ;;  %p1022_p10 = pnand %p1021_p1, %p1496_p6  ;;  %s1026_s9 = scalar_lea.vmem %s1025_s14, 256 }
  0xa7   : > { %p1027_p4 = scmp.lt.s32.totalorder %s1415_s25, %s1025_s14  ;;  %p1028_p9 = scmp.lt.s32.totalorder %s1026_s9, %s1020_s16 }
  0xa8   : > { %p1023_p3 = pneg %p1022_p10 }
  0xa9   : > { %802 = vmatpush3.bf16.msra.mxu0 %v801_v17  ;;  %p1029_p5 = por %p1028_p9, %p1027_p4 }
  0xaa   : > { %803 = vmatprep.subr.bf16.mxu0 %v1123_v4 }
  0xab   : > { %p1030_p7 = pnand %p1029_p5, %p1023_p3 }
  0xad   : > { %805 = vmatpush3.bf16.msra.mxu0 %v804_v22 }
  0xb0   : > { %786 = vmatmul.mubr.msk.f32.vlgmr.msra.gmra.mrb[0].mxu0 %vm477_vm1, %v365_v0 }
 0x110   : > { %v374_v20 = vpop.permute.xlu0 %373 }
 0x111   : > { %v376_v21 = vrot.slane %v374_v20, 7 }
 0x113   : > { %385 = vrot.lane.b32.xlu0 %v376_v21, %s1126_s27 }
 0x183   : > { %v546_v30 = vpop.f32.mrb[0].mxu0 }
 0x184   : > { %v787_v31 = vpop.f32.mrb[1].mxu0 }
 0x185   : > { %v386_v27 = vpop.permute.xlu0 %385 }
 0x186   : > { %v388_v28 = vsel %vm379_vm2, %v383_v26, %v386_v27 }
 0x187   : > { %402 = vrot.lane.b32.xlu1 %v388_v28, %s1122_s18 }
 0x1f9   : > { %v403_v29 = vpop.permute.xlu1 %402 }
 0x1fa   : > { %767 = vmatmul.mubr.msk.f32.vlgmr.msra.gmra.mrb[0].mxu1 %vm404_vm3, %v403_v29 }
 0x2cd   : > { %v473_v32 = vpop.f32.mrb[0].mxu1 }
 0x2ce   : > { %v547_v33 = vadd.f32 %v546_v30, %v473_v32  ;;  %v768_v34 = vpop.f32.mrb[1].mxu1 }
 0x2d0   : > { %v550_v35 = vsel %vm477_vm1, %v547_v33, 0.0  ;;  %v553_v36 = vmul.f32 %v547_v33, %v547_v33 }
 0x2d1   : > { %551 = vadd.xlane.f32.xlu1 %v550_v35 }
 0x2d2   : > { %v554_v37 = vsel %vm477_vm1, %v553_v36, 0.0 }
 0x2d3   : > { %555 = vadd.xlane.f32.xlu0 %v554_v37 }
 0x35e   : > { %v552_v38 = vpop.xlane.xlu1 %551 }
 0x35f   : > { %v557_v39 = vmul.f32 0.015625, %v552_v38 }
 0x360   : > { %v556_v40 = vpop.xlane.xlu0 %555 }
 0x361   : > { %v559_v41 = vmul.f32 %v557_v39, %v557_v39  ;;  %v558_v42 = vmul.f32 0.015625, %v556_v40  ;;  %v561_v45 = vsub.f32 %v547_v33, %v557_v39 }
 0x363   : > { %v560_v43 = vsub.f32 %v558_v42, %v559_v41 }
 0x365   : > { %v562_v44 = vadd.f32 1e-05, %v560_v43 }
 0x367   : > { %902 = vrsqrt.f32 %v562_v44 }
 0x371   : > { %v903_v46 = vpop.eup %902 }
 0x372   : > { %v564_v48 = vmul.f32 %v903_v46, %v561_v45 }
 0x374   : > { %v572_v50 = vmul.f32 %v738_v47, %v564_v48 }
 0x376   : > { %v580_v51 = vadd.f32 %v739_v49, %v572_v50 }
 0x378   : > { %581 = vst.msk [vmem:[%s361_s28] sm:$0xff] %vm477_vm1, %v580_v51 }
 0x379   : > { %1033 = shalt.err (!%p1030_p7)
}
 0x37a   : > { %s1034_s2 = scalar_lea.hbm %s1413_s11, 128  ;;  %s1038_s18 = scalar_lea.hbm %s1469_s6, 256 }
 0x37b   : > { %p1035_p13 = scmp.ne.s32.totalorder %s1413_s11, %s1034_s2  ;;  %p1039_p2 = scmp.lt.u32.totalorder %s1413_s11, %s1469_s6 }
 0x37c   : > { %p1040_p12 = scmp.lt.u32.totalorder %s1038_s18, %s1034_s2  ;;  %p1042_p1 = scmp.lt.u32.totalorder %s1034_s2, %s1413_s11 }
 0x37d   : > { %p1036_p8 = pnand %p1035_p13, %p1496_p6 }
 0x37e   : > { %p1041_p0 = por %p1040_p12, %p1039_p2 }
 0x37f   : > { %p1037_p11 = pneg %p1036_p8 }
 0x380   : > { %p1043_p10 = por %p1042_p1, %p1041_p0 }
 0x382   : > { %p1044_p3 = pnand %p1043_p10, %p1037_p11 }
 0x384   : > { %1047 = shalt.err (!%p1044_p3)
}
 0x385   : > { %819 = dma.vmem_to_hbm [thread:$0]  (%p1496_p6), %s1415_s25, 128, %s1413_s11, %s583_s19  }
 0x386 PF: > { %s609_s8 = sand.u32 1, %s1094_s21   ;;  %p1497_p4 = scmp.ne.s32.totalorder %s1480_s30, 0 }
 0x387   : > { %p1498_p9 = scmp.ge.s32.totalorder %s1114_s26, 2  ;;  %s610_s15 = scalar_lea.sflag [#allocation4], %s609_s8 }
 0x389   : > { %p836_p5 = pnand %p1498_p9, %p1497_p4 }
 0x38b   : > { %1089 = dma.done.wait (!%p836_p5), %s610_s15, 128  }
 0x38c   : > { %1091 = vsyncadd (!%p836_p5), %s610_s15, 4294967168  ;;  %s26_s26 = sadd.s32 1, %s1114_s26   ;;  %s1499_s10 = sld [smem:[#allocation18_spill]] }
 0x38d   : > { %p23_p7 = scmp.ge.s32.totalorder %s26_s26, 4   ;;  %s1500_s24 = sld [smem:[#allocation16_spill]] }
 0x38e   : > { %s1501_s25 = sld [smem:[#allocation17_spill]]  ;;  %s1502_s21 = smov %s1098_s22 }
 0x38f   : > { %s1503_s22 = smov %s1102_s23  ;;  %25 = sbr.rel (!%p23_p7) target bundleno = 12 (0xc), region = 110 }
 0x392   : > { %s1504_s23 = smov %s1499_s10 }
 0x396   :  { %615 = vsyncpa [#allocation3], 1 }
 0x397   :  { %617 = vsyncpa [#allocation3 + $0x1], 1 }
 0x398   :  { %618 = vsyncpa [#allocation6], 1 }
 0x399   :  { %620 = vsyncpa [#allocation6 + $0x1], 1 }
 0x39a   :  { %621 = vsyncpa [#allocation9], 1 }
 0x39b   :  { %622 = vsyncpa [#allocation4], 1 }
 0x39c   :  { %624 = vsyncpa [#allocation4 + $0x1], 1 }

</bundles_post_ra>
